<compile_context>
chip_gen: v5e
topology: v5e:2x2
jax: 0.10.0
libtpu: 0.0.40
codegen_flags: <defaults>
</compile_context>

<pallas_src>
import functools

import jax
import jax.numpy as jnp
from jax.experimental import pallas as pl
from jax.experimental.pallas import tpu as pltpu

KSIZE = 4
STRIDE = 2
PAD = 1
BN_EPS = 1e-5


# ---------------------------------------------------------------------------
# Pass 1: ReLU + sub-pixel ConvTranspose2d (one fused-K matmul per output
#         phase) + per-channel sum / sum-of-squares partials for BatchNorm.
# Grid: (N,), marked "arbitrary" because the stats output block is revisited
# (accumulated) across grid steps.
# ---------------------------------------------------------------------------
def _conv_stats_kernel(xcol_ref, wph_ref, y_ref, stats_ref):
    """
    xcol_ref : (1, 4, 4*Cin, H*W)  bf16  per-phase im2col of the padded input
    wph_ref  : (4, Cout, 4*Cin)    bf16  per-phase weight taps folded into K
    y_ref    : (1, 4, Cout, H*W)   f32   raw (pre-BN) conv output, phase-major
    stats_ref: (Cout, 2)           f32   [:,0] = sum, [:,1] = sum of squares
    """
    n = pl.program_id(0)

    @pl.when(n == 0)
    def _():
        stats_ref[...] = jnp.zeros_like(stats_ref)

    cout = wph_ref.shape[1]
    s_acc = jnp.zeros((cout, 1), jnp.float32)
    ss_acc = jnp.zeros((cout, 1), jnp.float32)

    for ph in range(4):  # static unroll over the 4 output parities (oy%2, ox%2)
        # ReLU inside the kernel: im2col only rearranges / zero-pads, and
        # relu(0) == 0, so relu(im2col(x)) == im2col(relu(x)).
        cols = jnp.maximum(xcol_ref[0, ph], 0)                      # (4Cin, HW) bf16
        yph = jnp.dot(wph_ref[ph], cols,
                      preferred_element_type=jnp.float32)           # (Cout, HW) f32
        y_ref[0, ph] = yph
        s_acc = s_acc + jnp.sum(yph, axis=-1, keepdims=True)
        ss_acc = ss_acc + jnp.sum(yph * yph, axis=-1, keepdims=True)

    stats_ref[:, 0:1] += s_acc
    stats_ref[:, 1:2] += ss_acc


# ---------------------------------------------------------------------------
# Pass 2: BatchNorm2d (folded scale/shift, batch statistics) + Dropout(0)
#         (identity) + channel concat with the residual.
# Grid: (N, OHW // TS), both axes "parallel" (megacore-friendly).
# ---------------------------------------------------------------------------
def _bn_concat_kernel(y_ref, res_ref, stats_ref, gamma_ref, beta_ref, out_ref,
                      *, inv_count):
    """
    y_ref    : (1, Cout, TS)       f32  conv output tile (NC(HW) layout)
    res_ref  : (1, Cres, TS)       f32  residual tile
    stats_ref: (Cout, 2)           f32  global sum / sum-of-squares
    gamma_ref: (Cout, 1)           f32  BN weight
    beta_ref : (Cout, 1)           f32  BN bias
    out_ref  : (1, Cout+Cres, TS)  f32  concatenated output tile
    """
    cout = y_ref.shape[1]
    cres = res_ref.shape[1]

    mean = stats_ref[:, 0:1] * inv_count                       # (Cout, 1)
    var = stats_ref[:, 1:2] * inv_count - mean * mean          # biased variance
    scale = gamma_ref[...] * jax.lax.rsqrt(var + BN_EPS)       # folded scale
    shift = beta_ref[...] - mean * scale                       # folded shift

    # one multiply-add per element; Dropout(p=0) is the identity
    out_ref[0, :cout, :] = y_ref[0] * scale + shift
    # residual pass-through (channel concat along a leading/sublane dim ->
    # full-lane, unmasked stores)
    out_ref[0, cout:cout + cres, :] = res_ref[0]


def _pick_spatial_tile(total, target=2048):
    """Largest multiple-of-128 divisor of `total` that is <= target; falls
    back to `total` (full dim) so the BlockSpec stays legal."""
    best = total
    t = 128
    while t <= min(total, target):
        if total % t == 0:
            best = t
        t += 128
    return best


def upblock_forward(x_nchw, residual_nchw, weight, gamma, beta):
    """x_nchw: (N, Cin, H, W); residual_nchw: (N, Cres, 2H, 2W);
    weight: ConvTranspose2d weight (Cin, Cout, 4, 4); gamma/beta: (Cout,).
    Returns (N, Cout + Cres, 2H, 2W) in float32 (NCHW)."""
    n, cin, h, w = x_nchw.shape
    oh, ow = STRIDE * h, STRIDE * w
    cout = weight.shape[1]
    cres = residual_nchw.shape[1]
    k = 4 * cin                     # 2x2 taps folded into the contraction dim
    hw, ohw = h * w, oh * ow
    ctot = cout + cres

    # --- sub-pixel decomposition of ConvTranspose2d(k=4, s=2, p=1) ----------
    # Output parity (py, px): out[:, :, 2p+py, 2q+px] is a 2x2 conv over the
    # original input (padded by 1) with taps ky = 3-py-2*ry, kx = 3-px-2*rx.
    # The per-phase im2col operand (taps folded into K) is built once in the
    # wrapper so the kernel contains no shifted slices / minor-dim reshapes.
    xp = jnp.pad(x_nchw.astype(jnp.bfloat16), ((0, 0), (0, 0), (1, 1), (1, 1)))
    w32 = weight.astype(jnp.float32)
    phases, wlist = [], []
    for py in (0, 1):
        for px in (0, 1):
            taps, wtaps = [], []
            for ry in (0, 1):
                for rx in (0, 1):
                    taps.append(xp[:, :, py + ry: py + ry + h,
                                   px + rx: px + rx + w])            # (N,Cin,H,W)
                    ky, kx = 3 - py - 2 * ry, 3 - px - 2 * rx
                    wtaps.append(w32[:, :, ky, kx].T)                # (Cout,Cin)
            phases.append(jnp.concatenate(taps, axis=1))             # (N,4Cin,H,W)
            wlist.append(jnp.concatenate(wtaps, axis=1))             # (Cout,4Cin)
    xcol = jnp.stack(phases, axis=1).reshape(n, 4, k, hw)            # bf16
    wph = jnp.stack(wlist, axis=0).astype(jnp.bfloat16)              # (4,Cout,4Cin)

    # ---- pass 1: ReLU + conv (4 lane-dense matmuls) + BN partial stats -----
    # TODO(synk): for very large Cin*H*W, add an output-row tile axis with a
    # +/-1 halo (or nested emit_pipeline) instead of one batch element/step.
    blk1 = 4 * k * hw * 2 + 4 * cout * k * 2 + 4 * cout * hw * 4 + cout * 8
    vmem1 = int(min(max(6 * blk1, 16 << 20), 32 << 20))
    y_raw, stats = pl.pallas_call(
        _conv_stats_kernel,
        out_shape=(
            jax.ShapeDtypeStruct((n, 4, cout, hw), jnp.float32),
            jax.ShapeDtypeStruct((cout, 2), jnp.float32),
        ),
        grid_spec=pltpu.PrefetchScalarGridSpec(
            num_scalar_prefetch=0,
            grid=(n,),
            in_specs=[
                pl.BlockSpec((1, 4, k, hw), lambda i: (i, 0, 0, 0)),
                pl.BlockSpec((4, cout, k), lambda i: (0, 0, 0)),
            ],
            out_specs=(
                pl.BlockSpec((1, 4, cout, hw), lambda i: (i, 0, 0, 0)),
                pl.BlockSpec((cout, 2), lambda i: (0, 0)),
            ),
        ),
        compiler_params=pltpu.CompilerParams(
            dimension_semantics=("arbitrary",),   # stats accumulate across n
            vmem_limit_bytes=vmem1,
        ),
        cost_estimate=pl.CostEstimate(
            flops=2 * n * 4 * cout * k * hw,
            transcendentals=0,
            bytes_accessed=xcol.size * 2 + wph.size * 2
            + (n * 4 * cout * hw + cout * 2) * 4,
        ),
    )(xcol, wph)

    # Re-interleave the 4 phases into NCHW and flatten spatial (pure layout
    # plumbing in the wrapper; keeps every kernel load/store lane-dense).
    y_nchw = (y_raw.reshape(n, 2, 2, cout, h, w)
              .transpose(0, 3, 4, 1, 5, 2)
              .reshape(n, cout, ohw))
    res_flat = residual_nchw.astype(jnp.float32).reshape(n, cres, ohw)

    # ---- pass 2: BatchNorm (global batch stats) + Dropout(0) + concat ------
    ts = _pick_spatial_tile(ohw)
    grid2 = (n, ohw // ts)
    blk2 = (cout + cres + ctot) * ts * 4 + cout * 16
    vmem2 = int(min(max(6 * blk2, 16 << 20), 32 << 20))
    out_flat = pl.pallas_call(
        functools.partial(_bn_concat_kernel, inv_count=1.0 / float(n * ohw)),
        out_shape=jax.ShapeDtypeStruct((n, ctot, ohw), jnp.float32),
        grid_spec=pltpu.PrefetchScalarGridSpec(
            num_scalar_prefetch=0,
            grid=grid2,
            in_specs=[
                pl.BlockSpec((1, cout, ts), lambda i, s: (i, 0, s)),
                pl.BlockSpec((1, cres, ts), lambda i, s: (i, 0, s)),
                pl.BlockSpec((cout, 2), lambda i, s: (0, 0)),
                pl.BlockSpec((cout, 1), lambda i, s: (0, 0)),
                pl.BlockSpec((cout, 1), lambda i, s: (0, 0)),
            ],
            out_specs=pl.BlockSpec((1, ctot, ts), lambda i, s: (i, 0, s)),
        ),
        compiler_params=pltpu.CompilerParams(
            dimension_semantics=("parallel", "parallel"),
            vmem_limit_bytes=vmem2,
        ),
        cost_estimate=pl.CostEstimate(
            flops=2 * n * ctot * ohw,
            transcendentals=cout * n * (ohw // ts),
            bytes_accessed=(n * (cout + cres + ctot) * ohw + cout * 4) * 4,
        ),
    )(y_nchw, res_flat, stats,
      gamma.reshape(cout, 1).astype(jnp.float32),
      beta.reshape(cout, 1).astype(jnp.float32))

    return out_flat.reshape(n, ctot, oh, ow)


if __name__ == "__main__":
    key = jax.random.PRNGKey(0)
    k1, k2, k3, k4, k5 = jax.random.split(key, 5)

    N, Cin, H, W = 2, 4, 16, 16
    Cout, Cres = 8, 8

    x = jax.random.normal(k1, (N, Cin, H, W), jnp.float32)
    residual = jax.random.normal(k2, (N, Cres, STRIDE * H, STRIDE * W),
                                 jnp.float32)
    # ConvTranspose2d weight layout: (in_ch, out_ch, kH, kW); BN affine params.
    weight = jax.random.normal(k3, (Cin, Cout, KSIZE, KSIZE), jnp.float32) * 0.1
    gamma = 1.0 + 0.1 * jax.random.normal(k4, (Cout,), jnp.float32)
    beta = 0.1 * jax.random.normal(k5, (Cout,), jnp.float32)

    out = jax.jit(upblock_forward)(x, residual, weight, gamma, beta)
    jax.block_until_ready(out)
    assert out.shape == (N, Cout + Cres, STRIDE * H, STRIDE * W)
    assert bool(jnp.isfinite(out).all())
    print("KERNEL_OK")
</pallas_src>

<mosaic_0001>
module attributes {stable_mosaic.version = 11 : i64} {
  func.func @_conv_stats_kernel(%arg0: i32, %arg1: memref<1x4x16x256xbf16, #tpu.memory_space<vmem>>, %arg2: memref<4x8x16xbf16, #tpu.memory_space<vmem>>, %arg3: memref<1x4x8x256xf32, #tpu.memory_space<vmem>>, %arg4: memref<8x2xf32, #tpu.memory_space<vmem>>) attributes {dimension_semantics = [#tpu.dimension_semantics<arbitrary>], iteration_bounds = array<i64: 2>, scalar_prefetch = 0 : i64, scratch_operands = 0 : i64, tpu.core_type = #tpu.core_type<tc>, window_params = [{transform_indices = @transform_0, window_bounds = array<i64: 1, 4, 16, 256>}, {pipeline_mode = #tpu.pipeline_mode<synchronous>, transform_indices = @transform_1, window_bounds = array<i64: 4, 8, 16>}, {transform_indices = @transform_2, window_bounds = array<i64: 1, 4, 8, 256>}, {pipeline_mode = #tpu.pipeline_mode<synchronous>, transform_indices = @transform_3, window_bounds = array<i64: 8, 2>}]} {
    %c0_i32 = arith.constant 0 : i32
    %0 = arith.cmpi eq, %arg0, %c0_i32 : i32
    %1 = arith.extui %0 : i1 to i32
    %c0_i32_0 = arith.constant 0 : i32
    %2 = arith.cmpi ne, %1, %c0_i32_0 : i32
    scf.if %2 {
      %cst_66 = arith.constant 0.000000e+00 : f32
      %79 = vector.broadcast %cst_66 : f32 to vector<8x2xf32>
      %c0_67 = arith.constant 0 : index
      %c0_68 = arith.constant 0 : index
      %80 = vector.load %arg4[%c0_67, %c0_68] : memref<8x2xf32, #tpu.memory_space<vmem>>, vector<8x2xf32>
      tpu.vector_store %arg4[%c0_67, %c0_68], %79 {strides = array<i32>} : memref<8x2xf32, #tpu.memory_space<vmem>>, vector<8x2xf32>,
    } else {
    }
    %cst = arith.constant 0.000000e+00 : f32
    %3 = vector.broadcast %cst : f32 to vector<8x1xf32>
    %cst_1 = arith.constant 0.000000e+00 : f32
    %4 = vector.broadcast %cst_1 : f32 to vector<8x1xf32>
    %c0 = arith.constant 0 : index
    %c0_2 = arith.constant 0 : index
    %c0_3 = arith.constant 0 : index
    %c0_4 = arith.constant 0 : index
    %5 = vector.load %arg1[%c0, %c0_2, %c0_3, %c0_4] : memref<1x4x16x256xbf16, #tpu.memory_space<vmem>>, vector<1x1x16x256xbf16>
    %6 = vector.shape_cast %5 : vector<1x1x16x256xbf16> to vector<16x256xbf16>
    %cst_5 = arith.constant 0.000000e+00 : bf16
    %7 = vector.broadcast %cst_5 : bf16 to vector<16x256xbf16>
    %8 = arith.maximumf %6, %7 : vector<16x256xbf16>
    %c0_6 = arith.constant 0 : index
    %c0_7 = arith.constant 0 : index
    %c0_8 = arith.constant 0 : index
    %9 = vector.load %arg2[%c0_6, %c0_7, %c0_8] : memref<4x8x16xbf16, #tpu.memory_space<vmem>>, vector<1x8x16xbf16>
    %10 = vector.shape_cast %9 : vector<1x8x16xbf16> to vector<8x16xbf16>
    %cst_9 = arith.constant dense<0.000000e+00> : vector<8x256xf32>
    %11 = tpu.matmul %10, %8, %cst_9 {dimension_numbers = #tpu.dot_dimension_numbers<[1], [0], [0], [1], [0, 0, 1, 1], [], []>} : vector<8x16xbf16>, vector<16x256xbf16>, vector<8x256xf32> -> vector<8x256xf32>
    %c0_10 = arith.constant 0 : index
    %c0_11 = arith.constant 0 : index
    %c0_12 = arith.constant 0 : index
    %c0_13 = arith.constant 0 : index
    %12 = vector.load %arg3[%c0_10, %c0_11, %c0_12, %c0_13] : memref<1x4x8x256xf32, #tpu.memory_space<vmem>>, vector<1x1x8x256xf32>
    %13 = vector.shape_cast %12 : vector<1x1x8x256xf32> to vector<8x256xf32>
    %14 = vector.shape_cast %11 : vector<8x256xf32> to vector<1x1x8x256xf32>
    tpu.vector_store %arg3[%c0_10, %c0_11, %c0_12, %c0_13], %14 {strides = array<i32>} : memref<1x4x8x256xf32, #tpu.memory_space<vmem>>, vector<1x1x8x256xf32>,
    %cst_14 = arith.constant dense<0.000000e+00> : vector<8xf32>
    %15 = vector.multi_reduction <add>, %11, %cst_14 [1] : vector<8x256xf32> to vector<8xf32>
    %16 = vector.shape_cast %15 : vector<8xf32> to vector<8x1xf32>
    %17 = arith.addf %3, %16 : vector<8x1xf32>
    %18 = arith.mulf %11, %11 : vector<8x256xf32>
    %cst_15 = arith.constant dense<0.000000e+00> : vector<8xf32>
    %19 = vector.multi_reduction <add>, %18, %cst_15 [1] : vector<8x256xf32> to vector<8xf32>
    %20 = vector.shape_cast %19 : vector<8xf32> to vector<8x1xf32>
    %21 = arith.addf %4, %20 : vector<8x1xf32>
    %c0_16 = arith.constant 0 : index
    %c1 = arith.constant 1 : index
    %c0_17 = arith.constant 0 : index
    %c0_18 = arith.constant 0 : index
    %22 = vector.load %arg1[%c0_16, %c1, %c0_17, %c0_18] : memref<1x4x16x256xbf16, #tpu.memory_space<vmem>>, vector<1x1x16x256xbf16>
    %23 = vector.shape_cast %22 : vector<1x1x16x256xbf16> to vector<16x256xbf16>
    %cst_19 = arith.constant 0.000000e+00 : bf16
    %24 = vector.broadcast %cst_19 : bf16 to vector<16x256xbf16>
    %25 = arith.maximumf %23, %24 : vector<16x256xbf16>
    %c1_20 = arith.constant 1 : index
    %c0_21 = arith.constant 0 : index
    %c0_22 = arith.constant 0 : index
    %26 = vector.load %arg2[%c1_20, %c0_21, %c0_22] : memref<4x8x16xbf16, #tpu.memory_space<vmem>>, vector<1x8x16xbf16>
    %27 = vector.shape_cast %26 : vector<1x8x16xbf16> to vector<8x16xbf16>
    %cst_23 = arith.constant dense<0.000000e+00> : vector<8x256xf32>
    %28 = tpu.matmul %27, %25, %cst_23 {dimension_numbers = #tpu.dot_dimension_numbers<[1], [0], [0], [1], [0, 0, 1, 1], [], []>} : vector<8x16xbf16>, vector<16x256xbf16>, vector<8x256xf32> -> vector<8x256xf32>
    %c0_24 = arith.constant 0 : index
    %c1_25 = arith.constant 1 : index
    %c0_26 = arith.constant 0 : index
    %c0_27 = arith.constant 0 : index
    %29 = vector.load %arg3[%c0_24, %c1_25, %c0_26, %c0_27] : memref<1x4x8x256xf32, #tpu.memory_space<vmem>>, vector<1x1x8x256xf32>
    %30 = vector.shape_cast %29 : vector<1x1x8x256xf32> to vector<8x256xf32>
    %31 = vector.shape_cast %28 : vector<8x256xf32> to vector<1x1x8x256xf32>
    tpu.vector_store %arg3[%c0_24, %c1_25, %c0_26, %c0_27], %31 {strides = array<i32>} : memref<1x4x8x256xf32, #tpu.memory_space<vmem>>, vector<1x1x8x256xf32>,
    %cst_28 = arith.constant dense<0.000000e+00> : vector<8xf32>
    %32 = vector.multi_reduction <add>, %28, %cst_28 [1] : vector<8x256xf32> to vector<8xf32>
    %33 = vector.shape_cast %32 : vector<8xf32> to vector<8x1xf32>
    %34 = arith.addf %17, %33 : vector<8x1xf32>
    %35 = arith.mulf %28, %28 : vector<8x256xf32>
    %cst_29 = arith.constant dense<0.000000e+00> : vector<8xf32>
    %36 = vector.multi_reduction <add>, %35, %cst_29 [1] : vector<8x256xf32> to vector<8xf32>
    %37 = vector.shape_cast %36 : vector<8xf32> to vector<8x1xf32>
    %38 = arith.addf %21, %37 : vector<8x1xf32>
    %c0_30 = arith.constant 0 : index
    %c2 = arith.constant 2 : index
    %c0_31 = arith.constant 0 : index
    %c0_32 = arith.constant 0 : index
    %39 = vector.load %arg1[%c0_30, %c2, %c0_31, %c0_32] : memref<1x4x16x256xbf16, #tpu.memory_space<vmem>>, vector<1x1x16x256xbf16>
    %40 = vector.shape_cast %39 : vector<1x1x16x256xbf16> to vector<16x256xbf16>
    %cst_33 = arith.constant 0.000000e+00 : bf16
    %41 = vector.broadcast %cst_33 : bf16 to vector<16x256xbf16>
    %42 = arith.maximumf %40, %41 : vector<16x256xbf16>
    %c2_34 = arith.constant 2 : index
    %c0_35 = arith.constant 0 : index
    %c0_36 = arith.constant 0 : index
    %43 = vector.load %arg2[%c2_34, %c0_35, %c0_36] : memref<4x8x16xbf16, #tpu.memory_space<vmem>>, vector<1x8x16xbf16>
    %44 = vector.shape_cast %43 : vector<1x8x16xbf16> to vector<8x16xbf16>
    %cst_37 = arith.constant dense<0.000000e+00> : vector<8x256xf32>
    %45 = tpu.matmul %44, %42, %cst_37 {dimension_numbers = #tpu.dot_dimension_numbers<[1], [0], [0], [1], [0, 0, 1, 1], [], []>} : vector<8x16xbf16>, vector<16x256xbf16>, vector<8x256xf32> -> vector<8x256xf32>
    %c0_38 = arith.constant 0 : index
    %c2_39 = arith.constant 2 : index
    %c0_40 = arith.constant 0 : index
    %c0_41 = arith.constant 0 : index
    %46 = vector.load %arg3[%c0_38, %c2_39, %c0_40, %c0_41] : memref<1x4x8x256xf32, #tpu.memory_space<vmem>>, vector<1x1x8x256xf32>
    %47 = vector.shape_cast %46 : vector<1x1x8x256xf32> to vector<8x256xf32>
    %48 = vector.shape_cast %45 : vector<8x256xf32> to vector<1x1x8x256xf32>
    tpu.vector_store %arg3[%c0_38, %c2_39, %c0_40, %c0_41], %48 {strides = array<i32>} : memref<1x4x8x256xf32, #tpu.memory_space<vmem>>, vector<1x1x8x256xf32>,
    %cst_42 = arith.constant dense<0.000000e+00> : vector<8xf32>
    %49 = vector.multi_reduction <add>, %45, %cst_42 [1] : vector<8x256xf32> to vector<8xf32>
    %50 = vector.shape_cast %49 : vector<8xf32> to vector<8x1xf32>
    %51 = arith.addf %34, %50 : vector<8x1xf32>
    %52 = arith.mulf %45, %45 : vector<8x256xf32>
    %cst_43 = arith.constant dense<0.000000e+00> : vector<8xf32>
    %53 = vector.multi_reduction <add>, %52, %cst_43 [1] : vector<8x256xf32> to vector<8xf32>
    %54 = vector.shape_cast %53 : vector<8xf32> to vector<8x1xf32>
    %55 = arith.addf %38, %54 : vector<8x1xf32>
    %c0_44 = arith.constant 0 : index
    %c3 = arith.constant 3 : index
    %c0_45 = arith.constant 0 : index
    %c0_46 = arith.constant 0 : index
    %56 = vector.load %arg1[%c0_44, %c3, %c0_45, %c0_46] : memref<1x4x16x256xbf16, #tpu.memory_space<vmem>>, vector<1x1x16x256xbf16>
    %57 = vector.shape_cast %56 : vector<1x1x16x256xbf16> to vector<16x256xbf16>
    %cst_47 = arith.constant 0.000000e+00 : bf16
    %58 = vector.broadcast %cst_47 : bf16 to vector<16x256xbf16>
    %59 = arith.maximumf %57, %58 : vector<16x256xbf16>
    %c3_48 = arith.constant 3 : index
    %c0_49 = arith.constant 0 : index
    %c0_50 = arith.constant 0 : index
    %60 = vector.load %arg2[%c3_48, %c0_49, %c0_50] : memref<4x8x16xbf16, #tpu.memory_space<vmem>>, vector<1x8x16xbf16>
    %61 = vector.shape_cast %60 : vector<1x8x16xbf16> to vector<8x16xbf16>
    %cst_51 = arith.constant dense<0.000000e+00> : vector<8x256xf32>
    %62 = tpu.matmul %61, %59, %cst_51 {dimension_numbers = #tpu.dot_dimension_numbers<[1], [0], [0], [1], [0, 0, 1, 1], [], []>} : vector<8x16xbf16>, vector<16x256xbf16>, vector<8x256xf32> -> vector<8x256xf32>
    %c0_52 = arith.constant 0 : index
    %c3_53 = arith.constant 3 : index
    %c0_54 = arith.constant 0 : index
    %c0_55 = arith.constant 0 : index
    %63 = vector.load %arg3[%c0_52, %c3_53, %c0_54, %c0_55] : memref<1x4x8x256xf32, #tpu.memory_space<vmem>>, vector<1x1x8x256xf32>
    %64 = vector.shape_cast %63 : vector<1x1x8x256xf32> to vector<8x256xf32>
    %65 = vector.shape_cast %62 : vector<8x256xf32> to vector<1x1x8x256xf32>
    tpu.vector_store %arg3[%c0_52, %c3_53, %c0_54, %c0_55], %65 {strides = array<i32>} : memref<1x4x8x256xf32, #tpu.memory_space<vmem>>, vector<1x1x8x256xf32>,
    %cst_56 = arith.constant dense<0.000000e+00> : vector<8xf32>
    %66 = vector.multi_reduction <add>, %62, %cst_56 [1] : vector<8x256xf32> to vector<8xf32>
    %67 = vector.shape_cast %66 : vector<8xf32> to vector<8x1xf32>
    %68 = arith.addf %51, %67 : vector<8x1xf32>
    %69 = arith.mulf %62, %62 : vector<8x256xf32>
    %cst_57 = arith.constant dense<0.000000e+00> : vector<8xf32>
    %70 = vector.multi_reduction <add>, %69, %cst_57 [1] : vector<8x256xf32> to vector<8xf32>
    %71 = vector.shape_cast %70 : vector<8xf32> to vector<8x1xf32>
    %72 = arith.addf %55, %71 : vector<8x1xf32>
    %c0_58 = arith.constant 0 : index
    %c0_59 = arith.constant 0 : index
    %73 = vector.load %arg4[%c0_58, %c0_59] : memref<8x2xf32, #tpu.memory_space<vmem>>, vector<8x1xf32>
    %74 = arith.addf %73, %68 : vector<8x1xf32>
    %c0_60 = arith.constant 0 : index
    %c0_61 = arith.constant 0 : index
    %75 = vector.load %arg4[%c0_60, %c0_61] : memref<8x2xf32, #tpu.memory_space<vmem>>, vector<8x1xf32>
    tpu.vector_store %arg4[%c0_60, %c0_61], %74 {strides = array<i32>} : memref<8x2xf32, #tpu.memory_space<vmem>>, vector<8x1xf32>,
    %c0_62 = arith.constant 0 : index
    %c1_63 = arith.constant 1 : index
    %76 = vector.load %arg4[%c0_62, %c1_63] : memref<8x2xf32, #tpu.memory_space<vmem>>, vector<8x1xf32>
    %77 = arith.addf %76, %72 : vector<8x1xf32>
    %c0_64 = arith.constant 0 : index
    %c1_65 = arith.constant 1 : index
    %78 = vector.load %arg4[%c0_64, %c1_65] : memref<8x2xf32, #tpu.memory_space<vmem>>, vector<8x1xf32>
    tpu.vector_store %arg4[%c0_64, %c1_65], %77 {strides = array<i32>} : memref<8x2xf32, #tpu.memory_space<vmem>>, vector<8x1xf32>,
    return
  }
  func.func @transform_0(%arg0: i32) -> (i32, i32, i32, i32) {
    %c0_i32 = arith.constant 0 : i32
    %c0_i32_0 = arith.constant 0 : i32
    %c0_i32_1 = arith.constant 0 : i32
    %c0_i32_2 = arith.constant 0 : i32
    return %arg0, %c0_i32, %c0_i32_0, %c0_i32_1 : i32, i32, i32, i32
  }
  func.func @transform_1(%arg0: i32) -> (i32, i32, i32) {
    %c0_i32 = arith.constant 0 : i32
    %c0_i32_0 = arith.constant 0 : i32
    %c0_i32_1 = arith.constant 0 : i32
    %c0_i32_2 = arith.constant 0 : i32
    return %c0_i32, %c0_i32_0, %c0_i32_1 : i32, i32, i32
  }
  func.func @transform_2(%arg0: i32) -> (i32, i32, i32, i32) {
    %c0_i32 = arith.constant 0 : i32
    %c0_i32_0 = arith.constant 0 : i32
    %c0_i32_1 = arith.constant 0 : i32
    %c0_i32_2 = arith.constant 0 : i32
    return %arg0, %c0_i32, %c0_i32_0, %c0_i32_1 : i32, i32, i32, i32
  }
  func.func @transform_3(%arg0: i32) -> (i32, i32) {
    %c0_i32 = arith.constant 0 : i32
    %c0_i32_0 = arith.constant 0 : i32
    %c0_i32_1 = arith.constant 0 : i32
    return %c0_i32, %c0_i32_0 : i32, i32
  }
}

module attributes {stable_mosaic.version = 11 : i64} {
  func.func @_bn_concat_kernel(%arg0: i32, %arg1: i32, %arg2: memref<1x8x1024xf32, #tpu.memory_space<vmem>>, %arg3: memref<1x8x1024xf32, #tpu.memory_space<vmem>>, %arg4: memref<8x2xf32, #tpu.memory_space<vmem>>, %arg5: memref<8x1xf32, #tpu.memory_space<vmem>>, %arg6: memref<8x1xf32, #tpu.memory_space<vmem>>, %arg7: memref<1x16x1024xf32, #tpu.memory_space<vmem>>) attributes {dimension_semantics = [#tpu.dimension_semantics<parallel>, #tpu.dimension_semantics<parallel>], iteration_bounds = array<i64: 2, 1>, scalar_prefetch = 0 : i64, scratch_operands = 0 : i64, tpu.core_type = #tpu.core_type<tc>, window_params = [{transform_indices = @transform_0, window_bounds = array<i64: 1, 8, 1024>}, {transform_indices = @transform_1, window_bounds = array<i64: 1, 8, 1024>}, {pipeline_mode = #tpu.pipeline_mode<synchronous>, transform_indices = @transform_2, window_bounds = array<i64: 8, 2>}, {pipeline_mode = #tpu.pipeline_mode<synchronous>, transform_indices = @transform_3, window_bounds = array<i64: 8, 1>}, {pipeline_mode = #tpu.pipeline_mode<synchronous>, transform_indices = @transform_4, window_bounds = array<i64: 8, 1>}, {transform_indices = @transform_5, window_bounds = array<i64: 1, 16, 1024>}]} {
    %c0 = arith.constant 0 : index
    %c0_0 = arith.constant 0 : index
    %0 = vector.load %arg4[%c0, %c0_0] : memref<8x2xf32, #tpu.memory_space<vmem>>, vector<8x1xf32>
    %cst = arith.constant 4.8828125E-4 : f32
    %1 = vector.broadcast %cst : f32 to vector<8x1xf32>
    %2 = arith.mulf %0, %1 : vector<8x1xf32>
    %c0_1 = arith.constant 0 : index
    %c1 = arith.constant 1 : index
    %3 = vector.load %arg4[%c0_1, %c1] : memref<8x2xf32, #tpu.memory_space<vmem>>, vector<8x1xf32>
    %cst_2 = arith.constant 4.8828125E-4 : f32
    %4 = vector.broadcast %cst_2 : f32 to vector<8x1xf32>
    %5 = arith.mulf %3, %4 : vector<8x1xf32>
    %6 = arith.mulf %2, %2 : vector<8x1xf32>
    %7 = arith.subf %5, %6 : vector<8x1xf32>
    %c0_3 = arith.constant 0 : index
    %c0_4 = arith.constant 0 : index
    %8 = vector.load %arg5[%c0_3, %c0_4] : memref<8x1xf32, #tpu.memory_space<vmem>>, vector<8x1xf32>
    %cst_5 = arith.constant 9.99999974E-6 : f32
    %9 = vector.broadcast %cst_5 : f32 to vector<8x1xf32>
    %10 = arith.addf %7, %9 : vector<8x1xf32>
    %11 = math.rsqrt %10 : vector<8x1xf32>
    %12 = arith.mulf %8, %11 : vector<8x1xf32>
    %c0_6 = arith.constant 0 : index
    %c0_7 = arith.constant 0 : index
    %13 = vector.load %arg6[%c0_6, %c0_7] : memref<8x1xf32, #tpu.memory_space<vmem>>, vector<8x1xf32>
    %14 = arith.mulf %2, %12 : vector<8x1xf32>
    %15 = arith.subf %13, %14 : vector<8x1xf32>
    %c0_8 = arith.constant 0 : index
    %c0_9 = arith.constant 0 : index
    %c0_10 = arith.constant 0 : index
    %16 = vector.load %arg2[%c0_8, %c0_9, %c0_10] : memref<1x8x1024xf32, #tpu.memory_space<vmem>>, vector<1x8x1024xf32>
    %17 = vector.shape_cast %16 : vector<1x8x1024xf32> to vector<8x1024xf32>
    %18 = vector.broadcast %12 : vector<8x1xf32> to vector<8x1024xf32>
    %19 = arith.mulf %17, %18 : vector<8x1024xf32>
    %20 = vector.broadcast %15 : vector<8x1xf32> to vector<8x1024xf32>
    %21 = arith.addf %19, %20 : vector<8x1024xf32>
    %c0_11 = arith.constant 0 : index
    %c0_12 = arith.constant 0 : index
    %c0_13 = arith.constant 0 : index
    %22 = vector.load %arg7[%c0_11, %c0_12, %c0_13] : memref<1x16x1024xf32, #tpu.memory_space<vmem>>, vector<1x8x1024xf32>
    %23 = vector.shape_cast %22 : vector<1x8x1024xf32> to vector<8x1024xf32>
    %24 = vector.shape_cast %21 : vector<8x1024xf32> to vector<1x8x1024xf32>
    tpu.vector_store %arg7[%c0_11, %c0_12, %c0_13], %24 {strides = array<i32>} : memref<1x16x1024xf32, #tpu.memory_space<vmem>>, vector<1x8x1024xf32>,
    %c0_14 = arith.constant 0 : index
    %c0_15 = arith.constant 0 : index
    %c0_16 = arith.constant 0 : index
    %25 = vector.load %arg3[%c0_14, %c0_15, %c0_16] : memref<1x8x1024xf32, #tpu.memory_space<vmem>>, vector<1x8x1024xf32>
    %26 = vector.shape_cast %25 : vector<1x8x1024xf32> to vector<8x1024xf32>
    %c0_17 = arith.constant 0 : index
    %c8 = arith.constant 8 : index
    %c0_18 = arith.constant 0 : index
    %27 = vector.load %arg7[%c0_17, %c8, %c0_18] : memref<1x16x1024xf32, #tpu.memory_space<vmem>>, vector<1x8x1024xf32>
    %28 = vector.shape_cast %27 : vector<1x8x1024xf32> to vector<8x1024xf32>
    %29 = vector.shape_cast %26 : vector<8x1024xf32> to vector<1x8x1024xf32>
    tpu.vector_store %arg7[%c0_17, %c8, %c0_18], %29 {strides = array<i32>} : memref<1x16x1024xf32, #tpu.memory_space<vmem>>, vector<1x8x1024xf32>,
    return
  }
  func.func @transform_0(%arg0: i32, %arg1: i32) -> (i32, i32, i32) {
    %c0_i32 = arith.constant 0 : i32
    %c0_i32_0 = arith.constant 0 : i32
    return %arg0, %c0_i32, %arg1 : i32, i32, i32
  }
  func.func @transform_1(%arg0: i32, %arg1: i32) -> (i32, i32, i32) {
    %c0_i32 = arith.constant 0 : i32
    %c0_i32_0 = arith.constant 0 : i32
    return %arg0, %c0_i32, %arg1 : i32, i32, i32
  }
  func.func @transform_2(%arg0: i32, %arg1: i32) -> (i32, i32) {
    %c0_i32 = arith.constant 0 : i32
    %c0_i32_0 = arith.constant 0 : i32
    %c0_i32_1 = arith.constant 0 : i32
    return %c0_i32, %c0_i32_0 : i32, i32
  }
  func.func @transform_3(%arg0: i32, %arg1: i32) -> (i32, i32) {
    %c0_i32 = arith.constant 0 : i32
    %c0_i32_0 = arith.constant 0 : i32
    %c0_i32_1 = arith.constant 0 : i32
    return %c0_i32, %c0_i32_0 : i32, i32
  }
  func.func @transform_4(%arg0: i32, %arg1: i32) -> (i32, i32) {
    %c0_i32 = arith.constant 0 : i32
    %c0_i32_0 = arith.constant 0 : i32
    %c0_i32_1 = arith.constant 0 : i32
    return %c0_i32, %c0_i32_0 : i32, i32
  }
  func.func @transform_5(%arg0: i32, %arg1: i32) -> (i32, i32, i32) {
    %c0_i32 = arith.constant 0 : i32
    %c0_i32_0 = arith.constant 0 : i32
    return %arg0, %c0_i32, %arg1 : i32, i32, i32
  }
}

</mosaic_0001>

<bundles_post_ra>
// kernel: upblock_forward.2
= control target key start
LH: loop header
LB: loop body
LE: loop exit
PB: predicated region body
PF: predicated region fallthrough
CT: control target
= control target key end

     0   :  { %s546_s12 = smov 0   ;;  %s618_s0 = inlined_call_operand.vmem [shape: bf16[2,4,16,256], index: 0, kind: input, shape index: {}]   ;;  %s619_s1 = inlined_call_operand.vmem [shape: bf16[4,8,16], index: 1, kind: input, shape index: {}]   ;;  %s620_s2 = inlined_call_operand.vmem [shape: f32[2,4,8,256], index: 2, kind: output, shape index: {0}]   ;;  %s621_s3 = inlined_call_operand.vmem [shape: f32[8,2], index: 3, kind: output, shape index: {1}]  }
   0x1 LB: > { %s471_s13 = sadd.s32 4294967295, %s523_s12   ;;  %p475_p0 = scmp.ge.s32.totalorder %s523_s12, 1  ;;  %s523_s12 = sphi %s546_s12, %s14_s12  }
   0x2   : > { %p135_p1 = scmp.lt.s32.totalorder %s523_s12, 3 }
   0x4   : > { %p136_p2 = pnand %p475_p0, %p135_p1 }
   0x5   : > { %p159_p3 = scmp.lt.s32.totalorder (!%p136_p2), %s471_s13, 1  ;;  %p480_p4 = scmp.ne.s32.totalorder (!%p136_p2), %s471_s13, 0 }
   0x6   : > { %139 = sbr.rel (%p136_p2) target bundleno = 312 (0x138), region = 28 }
   0xb   : > { %s160_s14 = scalar_select %p159_p3, %s471_s13, 1 }
   0xc   : > { %173 = sbr.rel (%p480_p4) target bundleno = 19 (0x13), region = 32 }
   0xd   : > { %s506_s15 = sshll.u32 %s160_s14, 6 }
   0xe   : > { %s557_s18 = scalar_lea.vmem %s618_s0, %s506_s15  ;;  %s562_s21 = scalar_lea.vmem %s620_s2, %s506_s15 }
  0x11   : > { %vm174_vm0 = vcmask 15360   ;;  %v525_v0 = vmov 0.0  }
  0x12   : > { %175 = vst.msk [vmem:[%s621_s3] sm:$0xff] %vm174_vm0, %v525_v0 }
  0x13 PF: > { %v176_v1 = vld [vmem:[%s557_s18] sm:$0xff]  ;;  %v177_v2 = vld [vmem:[%s557_s18 + $0x8] sm:$0xff]  ;;  %v483_v3 = vld [vmem:[%s557_s18 + $0x10] sm:$0xff]  ;;  %vm189_vm1 = vcmask 130048   ;;  %vm404_vm2 = vcmask 7168   ;;  %vm408_vm3 = vcmask 15368  }
  0x14   : > { %v178_v4 = vunpack.c.l.bf16 %v176_v1  ;;  %v180_v5 = vunpack.c.l.bf16 %v177_v2  ;;  %v179_v6 = vunpack.c.h.bf16 %v176_v1  ;;  %v181_v7 = vunpack.c.h.bf16 %v177_v2  ;;  %v484_v8 = vld [vmem:[%s557_s18 + $0x18] sm:$0xff]  ;;  %v490_v13 = vld [vmem:[%s557_s18 + $0x20] sm:$0xff]  ;;  %v491_v14 = vld [vmem:[%s557_s18 + $0x28] sm:$0xff] }
  0x15   : > { %v234_v9 = vunpack.c.l.bf16 %v483_v3  ;;  %v236_v10 = vunpack.c.l.bf16 %v484_v8  ;;  %v235_v11 = vunpack.c.h.bf16 %v483_v3  ;;  %v237_v12 = vunpack.c.h.bf16 %v484_v8  ;;  %v497_v23 = vld [vmem:[%s557_s18 + $0x30] sm:$0xff]  ;;  %v498_v24 = vld [vmem:[%s557_s18 + $0x38] sm:$0xff]  ;;  %v188_v33 = vld [vmem:[%s619_s1] sm:$0xf] }
  0x16   : > { %v182_v15 = vmax.f32 %v178_v4, 0.0  ;;  %v184_v16 = vmax.f32 %v180_v5, 0.0  ;;  %v183_v17 = vmax.f32 %v179_v6, 0.0  ;;  %v185_v18 = vmax.f32 %v181_v7, 0.0  ;;  %v485_v38 = vld [vmem:[%s619_s1 + $0x4] sm:$0xf] }
  0x17   : > { %v238_v19 = vmax.f32 %v234_v9, 0.0  ;;  %v240_v20 = vmax.f32 %v236_v10, 0.0  ;;  %v239_v21 = vmax.f32 %v235_v11, 0.0  ;;  %v241_v22 = vmax.f32 %v237_v12, 0.0  ;;  %v492_v51 = vld [vmem:[%s619_s1 + $0x8] sm:$0xf] }
  0x18   : > { %v186_v25 = vpack.c.bf16 %v184_v16, %v182_v15  ;;  %v187_v26 = vpack.c.bf16 %v185_v18, %v183_v17  ;;  %v291_v27 = vunpack.c.l.bf16 %v490_v13  ;;  %v293_v28 = vunpack.c.l.bf16 %v491_v14  ;;  %v499_v52 = vld [vmem:[%s619_s1 + $0xc] sm:$0xf] }
  0x19   : > { %v242_v29 = vpack.c.bf16 %v240_v20, %v238_v19  ;;  %v243_v30 = vpack.c.bf16 %v241_v22, %v239_v21  ;;  %v292_v31 = vunpack.c.h.bf16 %v490_v13  ;;  %v294_v32 = vunpack.c.h.bf16 %v491_v14 }
  0x1a   : > { %200 = vmatpush.bf16.msra.mxu0 %v186_v25  ;;  %213 = vmatpush.bf16.msra.mxu1 %v187_v26  ;;  %v295_v34 = vmax.f32 %v291_v27, 0.0  ;;  %v297_v35 = vmax.f32 %v293_v28, 0.0  ;;  %v348_v36 = vunpack.c.l.bf16 %v497_v23  ;;  %v350_v37 = vunpack.c.l.bf16 %v498_v24  ;;  %v402_v27 = vld [vmem:[%s621_s3] sm:$0xff] }
  0x1b   : > { %256 = vmatpush.bf16.msra.mxu2 %v242_v29  ;;  %269 = vmatpush.bf16.msra.mxu3 %v243_v30  ;;  %v296_v39 = vmax.f32 %v292_v31, 0.0  ;;  %v298_v40 = vmax.f32 %v294_v32, 0.0  ;;  %v349_v41 = vunpack.c.h.bf16 %v497_v23  ;;  %v351_v42 = vunpack.c.h.bf16 %v498_v24 }
  0x1c   : > { %v299_v43 = vpack.c.bf16 %v297_v35, %v295_v34  ;;  %v352_v44 = vmax.f32 %v348_v36, 0.0  ;;  %v354_v45 = vmax.f32 %v350_v37, 0.0 }
  0x1d   : > { %481 = vmatmul.msk.bf16.vlgmr.msra.gmra.mxu0 %vm189_vm1, %v188_v33  ;;  %482 = vmatmul.msk.bf16.vlgmr.msra.gmra.mxu1 %vm189_vm1, %v188_v33  ;;  %v300_v46 = vpack.c.bf16 %v298_v40, %v296_v39  ;;  %v353_v47 = vmax.f32 %v349_v41, 0.0  ;;  %v355_v48 = vmax.f32 %v351_v42, 0.0 }
  0x1e   : > { %486 = vmatmul.msk.bf16.vlgmr.msra.gmra.mxu2 %vm189_vm1, %v485_v38  ;;  %487 = vmatmul.msk.bf16.vlgmr.msra.gmra.mxu3 %vm189_vm1, %v485_v38  ;;  %v356_v49 = vpack.c.bf16 %v354_v45, %v352_v44 }
  0x1f   : > { %313 = vmatpush.bf16.msrb.mxu0 %v299_v43  ;;  %326 = vmatpush.bf16.msrb.mxu1 %v300_v46  ;;  %v357_v50 = vpack.c.bf16 %v355_v48, %v353_v47 }
  0x20   : > { %370 = vmatpush.bf16.msrb.mxu2 %v356_v49 }
  0x21   : > { %383 = vmatpush.bf16.msrb.mxu3 %v357_v50 }
  0x2d   : > { %493 = vmatmul.msk.bf16.vlgmr.msrb.gmra.mxu0 %vm189_vm1, %v492_v51  ;;  %494 = vmatmul.msk.bf16.vlgmr.msrb.gmra.mxu1 %vm189_vm1, %v492_v51 }
  0x2e   : > { %500 = vmatmul.msk.bf16.vlgmr.msrb.gmra.mxu2 %vm189_vm1, %v499_v52  ;;  %501 = vmatmul.msk.bf16.vlgmr.msrb.gmra.mxu3 %vm189_vm1, %v499_v52 }
  0x9a   : > { %v202_v53 = vpop.f32.mrf.mxu0  ;;  %v215_v54 = vpop.f32.mrf.mxu1 }
  0x9b   : > { %219 = vst [vmem:[%s562_s21] sm:$0xff] %v202_v53  ;;  %v221_v55 = vadd.f32 %v215_v54, %v202_v53  ;;  %v225_v56 = vmul.f32 %v202_v53, %v202_v53  ;;  %v226_v57 = vmul.f32 %v215_v54, %v215_v54 }
  0x9c   : > { %220 = vst [vmem:[%s562_s21 + $0x8] sm:$0xff] %v215_v54 }
  0x9d   : > { %222 = vadd.xlane.f32.xlu0 %v221_v55  ;;  %v227_v58 = vadd.f32 %v226_v57, %v225_v56 }
  0x9f   : > { %228 = vadd.xlane.f32.xlu2 %v227_v58 }
  0xa1   : > { %v258_v59 = vpop.f32.mrf.mxu2  ;;  %v271_v60 = vpop.f32.mrf.mxu3 }
  0xa2   : > { %488 = vst [vmem:[%s562_s21 + $0x10] sm:$0xff] %v258_v59  ;;  %v204_v61 = vpop.f32.mrf.mxu0  ;;  %v217_v62 = vpop.f32.mrf.mxu1  ;;  %v278_v63 = vadd.f32 %v271_v60, %v258_v59  ;;  %v282_v0 = vmul.f32 %v258_v59, %v258_v59  ;;  %v283_v1 = vmul.f32 %v271_v60, %v271_v60 }
  0xa3   : > { %489 = vst [vmem:[%s562_s21 + $0x18] sm:$0xff] %v271_v60 }
  0xa4   : > { %v284_v2 = vadd.f32 %v283_v1, %v282_v0 }
  0xa5   : > { %279 = vadd.xlane.f32.xlu0 %v278_v63 }
  0xa7   : > { %285 = vadd.xlane.f32.xlu2 %v284_v2 }
  0xa9   : > { %v260_v3 = vpop.f32.mrf.mxu2  ;;  %v273_v4 = vpop.f32.mrf.mxu3 }
  0xaa   : > { %v315_v5 = vpop.f32.mrf.mxu0  ;;  %v328_v6 = vpop.f32.mrf.mxu1 }
  0xab   : > { %495 = vst [vmem:[%s562_s21 + $0x20] sm:$0xff] %v315_v5  ;;  %v335_v7 = vadd.f32 %v328_v6, %v315_v5  ;;  %v339_v8 = vmul.f32 %v315_v5, %v315_v5  ;;  %v340_v9 = vmul.f32 %v328_v6, %v328_v6 }
  0xac   : > { %496 = vst [vmem:[%s562_s21 + $0x28] sm:$0xff] %v328_v6 }
  0xad   : > { %336 = vadd.xlane.f32.xlu1 %v335_v7  ;;  %v341_v10 = vadd.f32 %v340_v9, %v339_v8 }
  0xaf   : > { %342 = vadd.xlane.f32.xlu0 %v341_v10 }
  0xb1   : > { %v372_v11 = vpop.f32.mrf.mxu2  ;;  %v385_v12 = vpop.f32.mrf.mxu3 }
  0xb2   : > { %502 = vst [vmem:[%s562_s21 + $0x30] sm:$0xff] %v372_v11  ;;  %v317_v13 = vpop.f32.mrf.mxu0  ;;  %v330_v14 = vpop.f32.mrf.mxu1  ;;  %v392_v15 = vadd.f32 %v385_v12, %v372_v11  ;;  %v396_v16 = vmul.f32 %v372_v11, %v372_v11  ;;  %v397_v17 = vmul.f32 %v385_v12, %v385_v12 }
  0xb3   : > { %503 = vst [vmem:[%s562_s21 + $0x38] sm:$0xff] %v385_v12 }
  0xb4   : > { %v398_v20 = vadd.f32 %v397_v17, %v396_v16 }
  0xb5   : > { %393 = vadd.xlane.f32.xlu1 %v392_v15 }
  0xb9   : > { %v374_v18 = vpop.f32.mrf.mxu2  ;;  %v387_v19 = vpop.f32.mrf.mxu3 }
  0xbd   : > { %399 = vadd.xlane.f32.xlu1 %v398_v20 }
 0x110   : > { %v223_v21 = vpop.xlane.xlu0 %222 }
 0x112   : > { %v229_v23 = vpop.xlane.xlu2 %228 }
 0x118   : > { %v280_v24 = vpop.xlane.xlu0 %279 }
 0x119   : > { %v281_v25 = vadd.f32 %v280_v24, %v223_v21 }
 0x11a   : > { %v286_v31 = vpop.xlane.xlu2 %285 }
 0x11b   : > { %v287_v33 = vadd.f32 %v286_v31, %v229_v23 }
 0x120   : > { %v337_v22 = vpop.xlane.xlu1 %336 }
 0x121   : > { %v338_v26 = vadd.f32 %v337_v22, %v281_v25 }
 0x122   : > { %v343_v32 = vpop.xlane.xlu0 %342 }
 0x123   : > { %v344_v35 = vadd.f32 %v343_v32, %v287_v33 }
 0x128   : > { %v394_v28 = vpop.xlane.xlu1 %393 }
 0x129   : > { %v395_v29 = vadd.f32 %v394_v28, %v338_v26 }
 0x12b   : > { %v403_v30 = vadd.f32 %v402_v27, %v395_v29 }
 0x12d   : > { %405 = vst.msk [vmem:[%s621_s3] sm:$0xff] %vm404_vm2, %v403_v30 }
 0x130   : > { %v400_v34 = vpop.xlane.xlu1 %399 }
 0x131   : > { %v401_v36 = vadd.f32 %v400_v34, %v344_v35 }
 0x134   : > { %v406_v37 = vld [vmem:[%s621_s3] sm:$0xff] }
 0x135   : > { %v407_v38 = vadd.f32 %v406_v37, %v401_v36 }
 0x137   : > { %409 = vst.msk [vmem:[%s621_s3] sm:$0xff] %vm408_vm3, %v407_v38 }
 0x138 PF: > { %s14_s12 = sadd.s32 1, %s523_s12  }
 0x139   : > { %p11_p5 = scmp.ge.s32.totalorder %s14_s12, 4  }
 0x13b   :  { %13 = sbr.rel (!%p11_p5) target bundleno = 1 (0x1), region = 79 }

// kernel: upblock_forward.3
= control target key start
LH: loop header
LB: loop body
LE: loop exit
PB: predicated region body
PF: predicated region fallthrough
CT: control target
= control target key end

     0   :  { %s595_s18 = smov 0   ;;  %s597_s19 = smov 0   ;;  %s662_s0 = inlined_call_operand.vmem [shape: f32[2,8,1024], index: 0, kind: input, shape index: {}]   ;;  %s663_s1 = inlined_call_operand.vmem [shape: f32[2,8,1024], index: 1, kind: input, shape index: {}]   ;;  %s664_s2 = inlined_call_operand.vmem [shape: f32[8,2], index: 2, kind: input, shape index: {}]   ;;  %s665_s3 = inlined_call_operand.vmem [shape: f32[8,1], index: 3, kind: input, shape index: {}]   ;;  %s666_s4 = inlined_call_operand.vmem [shape: f32[8,1], index: 4, kind: input, shape index: {}]   ;;  %s667_s5 = inlined_call_operand.vmem [shape: f32[2,16,1024], index: 5, kind: output, shape index: {}]  }
   0x1   :  { %s599_s20 = smov 0  }
   0x2 LB: > { %s27_s21 = sadd.s32 1, %s556_s19  ;;  %p495_p0 = scmp.ge.s32.totalorder %s560_s20, 1  ;;  %s560_s20 = sphi %s599_s20, %s15_s20   ;;  %s556_s19 = sphi %s597_s19, %s669_s19   ;;  %s552_s18 = sphi %s595_s18, %s668_s18  }
   0x3   : > { %p29_p1 = scmp.ge.s32.totalorder %s27_s21, 2  ;;  %p225_p2 = scmp.lt.s32.totalorder %s560_s20, 3 }
   0x5   : > { %s671_s21 = smov (%p29_p1, %s27_s21), 0  ;;  %p226_p3 = pnand %p495_p0, %p225_p2 }
   0x6   : > { %s562_s24 = smov (!%p226_p3), 1   ;;  %s563_s25 = smov (!%p226_p3), 127  }
   0x7   : > { %229 = sbr.rel (%p226_p3) target bundleno = 404 (0x194), region = 40  ;;  %p271_p4 = scmp.lt.s32.totalorder (!%p226_p3), %s552_s18, 1 }
   0xc   : > { %v300_v0 = vld [vmem:[%s664_s2] sm:$0xff]  ;;  %v564_v13 = vmov 0   ;;  %s673_s18 = smov (!%p271_p4, %s552_s18), 1 }
   0xd   : > { %v301_v1 = vmul.f32 0.00048828125, %v300_v0  ;;  %534 = vset.pattern.permute.xlu1 %v564_v13  ;;  %535 = vset.pattern.permute.xlu0 %v564_v13  ;;  %v308_v14 = vld [vmem:[%s665_s3] sm:$0xff]  ;;  %s506_s30 = sshll.u32 %s673_s18, 7  ;;  %s504_s6 = sshll.u32 %s673_s18, 6 }
   0xe   : > { %v325_v18 = vld [vmem:[%s666_s4] sm:$0xff]  ;;  %s288_s9 = scalar_lea.vmem %s663_s1, %s504_s6  ;;  %s632_s12 = scalar_lea.vmem %s667_s5, %s506_s30 }
   0xf   : > { %v302_v2 = vmul.f32 %v301_v1, %v301_v1  ;;  %v370_v20 = vld [vmem:[%s288_s9] sm:$0xff]  ;;  %v371_v21 = vld [vmem:[%s288_s9 + $0x8] sm:$0xff]  ;;  %v372_v22 = vld [vmem:[%s288_s9 + $0x10] sm:$0xff]  ;;  %s278_s15 = scalar_lea.vmem %s662_s0, %s504_s6 }
  0x10   : > { %v373_v23 = vld [vmem:[%s288_s9 + $0x18] sm:$0xff]  ;;  %378 = vst [vmem:[%s632_s12 + $0x40] sm:$0xff] %v370_v20  ;;  %v374_v24 = vld [vmem:[%s288_s9 + $0x20] sm:$0xff]  ;;  %v375_v25 = vld [vmem:[%s288_s9 + $0x28] sm:$0xff] }
  0x11   : > { %304 = vrot.lane.b32.xlu0 %v302_v2, %s562_s24  ;;  %379 = vst [vmem:[%s632_s12 + $0x48] sm:$0xff] %v371_v21  ;;  %v376_v26 = vld [vmem:[%s288_s9 + $0x30] sm:$0xff]  ;;  %v377_v27 = vld [vmem:[%s288_s9 + $0x38] sm:$0xff] }
  0x12   : > { %380 = vst [vmem:[%s632_s12 + $0x50] sm:$0xff] %v372_v22  ;;  %v328_v29 = vld [vmem:[%s278_s15] sm:$0xff]  ;;  %v329_v30 = vld [vmem:[%s278_s15 + $0x8] sm:$0xff]  ;;  %v330_v31 = vld [vmem:[%s278_s15 + $0x10] sm:$0xff] }
  0x13   : > { %381 = vst [vmem:[%s632_s12 + $0x58] sm:$0xff] %v373_v23  ;;  %v331_v32 = vld [vmem:[%s278_s15 + $0x18] sm:$0xff]  ;;  %v332_v33 = vld [vmem:[%s278_s15 + $0x20] sm:$0xff]  ;;  %v333_v34 = vld [vmem:[%s278_s15 + $0x28] sm:$0xff] }
  0x14   : > { %382 = vst [vmem:[%s632_s12 + $0x60] sm:$0xff] %v374_v24  ;;  %v334_v39 = vld [vmem:[%s278_s15 + $0x30] sm:$0xff]  ;;  %v335_v41 = vld [vmem:[%s278_s15 + $0x38] sm:$0xff] }
  0x15   : > { %383 = vst [vmem:[%s632_s12 + $0x68] sm:$0xff] %v375_v25 }
  0x16   : > { %384 = vst [vmem:[%s632_s12 + $0x70] sm:$0xff] %v376_v26 }
  0x17   : > { %385 = vst [vmem:[%s632_s12 + $0x78] sm:$0xff] %v377_v27 }
  0x83   : > { %v305_v3 = vpop.permute.xlu0 %304 }
  0x84   : > { %v307_v4 = vsub.f32 %v301_v1, %v305_v3 }
  0x86   : > { %v309_v5 = vadd.f32 1e-05, %v307_v4 }
  0x88   : > { %536 = vrsqrt.f32 %v309_v5  ;;  %vm316_vm1 = vweird.f32 %v309_v5 }
  0x8e   : > { %v537_v6 = vpop.eup %536 }
  0x8f   : > { %v311_v7 = vmul.f32 %v537_v6, %v309_v5  ;;  %vm317_vm0 = vweird.f32 %v537_v6 }
  0x90   : > { %vm318_vm2 = vmor %vm316_vm1, %vm317_vm0 }
  0x91   : > { %v312_v8 = vmul.f32 %v537_v6, %v311_v7 }
  0x93   : > { %v313_v9 = vmul.f32 0.5, %v312_v8 }
  0x95   : > { %v314_v10 = vsub.f32 1.5, %v313_v9 }
  0x97   : > { %v315_v11 = vmul.f32 %v537_v6, %v314_v10 }
  0x99   : > { %v319_v12 = vsel %vm318_vm2, %v537_v6, %v315_v11 }
  0x9a   : > { %321 = vrot.lane.b32.xlu0 %v319_v12, %s563_s25 }
 0x10c   : > { %v322_v15 = vpop.permute.xlu0 %321 }
 0x10d   : > { %v324_v16 = vmul.f32 %v322_v15, %v308_v14 }
 0x10f   : > { %338 = vperm.xlu1 %534, %v324_v16   ;;  %v326_v17 = vmul.f32 %v324_v16, %v301_v1 }
 0x111   : > { %v327_v19 = vsub.f32 %v325_v18, %v326_v17 }
 0x117   : > { %351 = vperm.xlu1 %534, %v327_v19  }
 0x181   : > { %v339_v28 = vpop.permute.xlu1 %338 }
 0x182   : > { %v341_v35 = vmul.f32 %v339_v28, %v328_v29  ;;  %v342_v36 = vmul.f32 %v339_v28, %v329_v30  ;;  %v343_v37 = vmul.f32 %v339_v28, %v330_v31  ;;  %v344_v40 = vmul.f32 %v339_v28, %v331_v32 }
 0x183   : > { %v345_v42 = vmul.f32 %v339_v28, %v332_v33  ;;  %v346_v46 = vmul.f32 %v339_v28, %v333_v34  ;;  %v347_v48 = vmul.f32 %v339_v28, %v334_v39  ;;  %v348_v50 = vmul.f32 %v339_v28, %v335_v41 }
 0x189   : > { %v352_v38 = vpop.permute.xlu1 %351 }
 0x18a   : > { %v354_v43 = vadd.f32 %v352_v38, %v341_v35  ;;  %v355_v44 = vadd.f32 %v352_v38, %v342_v36  ;;  %v356_v45 = vadd.f32 %v352_v38, %v343_v37  ;;  %v357_v47 = vadd.f32 %v352_v38, %v344_v40 }
 0x18b   : > { %v358_v49 = vadd.f32 %v352_v38, %v345_v42  ;;  %v359_v51 = vadd.f32 %v352_v38, %v346_v46  ;;  %v360_v52 = vadd.f32 %v352_v38, %v347_v48  ;;  %v361_v53 = vadd.f32 %v352_v38, %v348_v50 }
 0x18c   : > { %362 = vst [vmem:[%s632_s12] sm:$0xff] %v354_v43 }
 0x18d   : > { %363 = vst [vmem:[%s632_s12 + $0x8] sm:$0xff] %v355_v44 }
 0x18e   : > { %364 = vst [vmem:[%s632_s12 + $0x10] sm:$0xff] %v356_v45 }
 0x18f   : > { %365 = vst [vmem:[%s632_s12 + $0x18] sm:$0xff] %v357_v47 }
 0x190   : > { %366 = vst [vmem:[%s632_s12 + $0x20] sm:$0xff] %v358_v49 }
 0x191   : > { %367 = vst [vmem:[%s632_s12 + $0x28] sm:$0xff] %v359_v51 }
 0x192   : > { %368 = vst [vmem:[%s632_s12 + $0x30] sm:$0xff] %v360_v52 }
 0x193   : > { %369 = vst [vmem:[%s632_s12 + $0x38] sm:$0xff] %v361_v53 }
 0x194 PF: > { %s15_s20 = sadd.s32 1, %s560_s20   ;;  %s668_s18 = smov %s556_s19 }
 0x195   : > { %p12_p5 = scmp.ge.s32.totalorder %s15_s20, 4   ;;  %s669_s19 = smov %s671_s21 }
 0x197   :  { %14 = sbr.rel (!%p12_p5) target bundleno = 2 (0x2), region = 73 }

</bundles_post_ra>
